<compile_context>
chip_gen: v6e
topology: v6e:2x2x1
jax: 0.10.0
libtpu: 0.0.40
codegen_flags: <defaults>
</compile_context>

<pallas_src>
import jax
import jax.numpy as jnp
from jax.experimental import pallas as pl
from jax.experimental.pallas import tpu as pltpu

# ---------------- small CLIP-ViT config ----------------
BATCH = 2
IMG = 16
PATCH = 8
CH = 3
HIDDEN = 32
HEADS = 4
HEAD_DIM = HIDDEN // HEADS
MLP = 64
LAYERS = 2
GRID_HW = IMG // PATCH
NUM_PATCHES = GRID_HW * GRID_HW          # 4
SEQ = NUM_PATCHES + 1                    # 5 (cls + patches)
PATCH_DIM = CH * PATCH * PATCH           # 192
EPS = 1e-5
SCALE = HEAD_DIM ** -0.5


# ---------------- shared helpers ----------------
def _layernorm(x, w, b):
    mu = jnp.mean(x, axis=-1, keepdims=True)
    var = jnp.mean((x - mu) ** 2, axis=-1, keepdims=True)
    return (x - mu) * jax.lax.rsqrt(var + EPS) * w + b


def _extract_patches(images):
    """NCHW -> (B, NUM_PATCHES, C*p*p) with (c, ph, pw) flattening order."""
    B = images.shape[0]
    x = images.astype(jnp.float32).reshape(B, CH, GRID_HW, PATCH, GRID_HW, PATCH)
    x = x.transpose(0, 2, 4, 1, 3, 5)                     # B, gh, gw, C, ph, pw
    return x.reshape(B, NUM_PATCHES, PATCH_DIM)


# ---------------- Pallas kernel: one (image, layer) grid step ----------------
def _clip_encoder_kernel(x_ref, emb_ref, wp_ref, pw_ref, pb_ref,
                         lnw_ref, lnb_ref,
                         wqkv_ref, bqkv_ref, wout_ref, bout_ref,
                         wfc1_ref, bfc1_ref, wfc2_ref, bfc2_ref,
                         o_ref):
    f32, bf16 = jnp.float32, jnp.bfloat16

    # ---- first layer step only: patch embedding (stride-P conv as one matmul),
    #      cls/pos bias, pre_layernorm.  x has a zero row at the CLS slot; emb
    #      carries cls_token (folded into row 0) + position embeddings.          ----
    @pl.when(pl.program_id(1) == 0)
    def _():
        pe = jnp.dot(x_ref[...], wp_ref[...], preferred_element_type=f32)  # (SEQ, H)
        o_ref[...] = _layernorm(pe + emb_ref[...], pw_ref[...], pb_ref[...])

    # Residual stream: f32, VMEM-resident across all layer steps of this image.
    h = o_ref[...]

    ln_w = lnw_ref[...]                                   # (2, H): [ln1; ln2]
    ln_b = lnb_ref[...]

    # -------- self-attention (pre-LN, CLIP scales Q) --------
    hn = _layernorm(h, ln_w[0:1], ln_b[0:1])
    qkv = jnp.dot(hn.astype(bf16), wqkv_ref[...], preferred_element_type=f32)
    qkv = qkv + bqkv_ref[...]                             # (SEQ, 3H) f32
    q = (qkv[:, 0:HIDDEN] * SCALE).astype(bf16)
    k = qkv[:, HIDDEN:2 * HIDDEN].astype(bf16)
    v = qkv[:, 2 * HIDDEN:3 * HIDDEN].astype(bf16)

    ctx_heads = []
    for hd in range(HEADS):
        sl = slice(hd * HEAD_DIM, (hd + 1) * HEAD_DIM)
        # K-transpose folded into the contraction (no materialized .T).
        s = jnp.einsum('qd,kd->qk', q[:, sl], k[:, sl], preferred_element_type=f32)
        s = s - jnp.max(s, axis=-1, keepdims=True)
        p = jnp.exp(s)
        p = p * pl.reciprocal(jnp.sum(p, axis=-1, keepdims=True), approx=True)
        ctx_heads.append(jnp.dot(p.astype(bf16), v[:, sl], preferred_element_type=f32))
    ctx = jnp.concatenate(ctx_heads, axis=-1)             # (SEQ, HIDDEN)

    attn = jnp.dot(ctx.astype(bf16), wout_ref[...], preferred_element_type=f32)
    h = h + attn + bout_ref[...]                          # residual

    # -------- MLP (quick_gelu) --------
    hn = _layernorm(h, ln_w[1:2], ln_b[1:2])
    u = jnp.dot(hn.astype(bf16), wfc1_ref[...], preferred_element_type=f32) + bfc1_ref[...]
    u = u * jax.nn.sigmoid(1.702 * u)                     # quick_gelu (f32)
    d = jnp.dot(u.astype(bf16), wfc2_ref[...], preferred_element_type=f32)
    h = h + d + bfc2_ref[...]                             # residual

    # NOTE: at toy HIDDEN=32 this is a masked (<128-lane) store; at production
    # HIDDEN (a multiple of 128) the output slab is lane-dense.
    o_ref[...] = h


# ---------------- parameter construction (deterministic, packed layout) --------------
def init_params(key):
    bf16 = jnp.bfloat16

    def nrm(k, shape, scale=0.02):
        return scale * jax.random.normal(k, shape, dtype=jnp.float32)

    k_top = jax.random.split(key, 5 + LAYERS)
    params = {
        # Conv2d(CH, HIDDEN, kernel=PATCH, stride=PATCH, bias=False) as a matmul
        "w_patch": nrm(k_top[0], (PATCH_DIM, HIDDEN)).astype(bf16),
        "cls": nrm(k_top[1], (HIDDEN,)),
        "pos": nrm(k_top[2], (SEQ, HIDDEN)),
        "pre_ln_w": 1.0 + nrm(k_top[3], (1, HIDDEN)),
        "pre_ln_b": nrm(k_top[4], (1, HIDDEN)),
    }

    w_qkv, w_out, w_fc1, w_fc2 = [], [], [], []
    b_qkv, b_out, b_fc1, b_fc2, ln_w, ln_b = [], [], [], [], [], []
    for li in range(LAYERS):
        lk = jax.random.split(k_top[5 + li], 12)
        wq, wk, wv = (nrm(lk[0], (HIDDEN, HIDDEN)),
                      nrm(lk[1], (HIDDEN, HIDDEN)),
                      nrm(lk[2], (HIDDEN, HIDDEN)))
        w_qkv.append(jnp.concatenate([wq, wk, wv], axis=1))        # (H, 3H)
        w_out.append(nrm(lk[3], (HIDDEN, HIDDEN)))
        w_fc1.append(nrm(lk[4], (HIDDEN, MLP)))
        w_fc2.append(nrm(lk[5], (MLP, HIDDEN)))
        b_qkv.append(nrm(lk[6], (1, 3 * HIDDEN)))
        b_out.append(nrm(lk[7], (1, HIDDEN)))
        b_fc1.append(nrm(lk[8], (1, MLP)))
        b_fc2.append(nrm(lk[9], (1, HIDDEN)))
        ln_w.append(1.0 + nrm(lk[10], (2, HIDDEN)))                # [ln1_w; ln2_w]
        ln_b.append(nrm(lk[11], (2, HIDDEN)))                      # [ln1_b; ln2_b]

    params["w_qkv"] = jnp.stack(w_qkv).astype(bf16)                # (L, H, 3H) bf16
    params["b_qkv"] = jnp.stack(b_qkv)                             # (L, 1, 3H) f32
    params["w_out"] = jnp.stack(w_out).astype(bf16)                # (L, H, H)
    params["b_out"] = jnp.stack(b_out)
    params["w_fc1"] = jnp.stack(w_fc1).astype(bf16)                # (L, H, MLP)
    params["b_fc1"] = jnp.stack(b_fc1)
    params["w_fc2"] = jnp.stack(w_fc2).astype(bf16)                # (L, MLP, H)
    params["b_fc2"] = jnp.stack(b_fc2)
    params["ln_w"] = jnp.stack(ln_w)                               # (L, 2, H)
    params["ln_b"] = jnp.stack(ln_b)
    return params


# ---------------- forward (CLIPEncoder.forward equivalent) ----------------
@jax.jit
def clip_encoder_forward(images, params):
    """images: [B, 3, H, W] -> last_hidden_state [B, SEQ, HIDDEN]."""
    B = images.shape[0]
    patches = _extract_patches(images)                    # (B, P, PATCH_DIM) f32
    # Zero row at the CLS slot: the in-kernel patch-embed matmul then yields a
    # zero CLS row, and emb_bias (pos with cls_token folded into row 0) supplies it.
    x_aug = jnp.concatenate(
        [jnp.zeros((B, 1, PATCH_DIM), jnp.float32), patches], axis=1
    ).astype(jnp.bfloat16)                                # (B, SEQ, PATCH_DIM)
    emb_bias = params["pos"].at[0].add(params["cls"])     # (SEQ, HIDDEN) f32 (no tiling)

    H3 = 3 * HIDDEN
    grid_spec = pltpu.PrefetchScalarGridSpec(
        num_scalar_prefetch=0,
        grid=(B, LAYERS),                                 # (parallel, arbitrary)
        in_specs=[
            pl.BlockSpec((None, SEQ, PATCH_DIM), lambda b, l: (b, 0, 0)),   # x_aug
            pl.BlockSpec((SEQ, HIDDEN),          lambda b, l: (0, 0)),      # emb_bias
            pl.BlockSpec((PATCH_DIM, HIDDEN),    lambda b, l: (0, 0)),      # w_patch
            pl.BlockSpec((1, HIDDEN),            lambda b, l: (0, 0)),      # pre_ln_w
            pl.BlockSpec((1, HIDDEN),            lambda b, l: (0, 0)),      # pre_ln_b
            pl.BlockSpec((None, 2, HIDDEN),      lambda b, l: (l, 0, 0)),   # ln_w
            pl.BlockSpec((None, 2, HIDDEN),      lambda b, l: (l, 0, 0)),   # ln_b
            pl.BlockSpec((None, HIDDEN, H3),     lambda b, l: (l, 0, 0)),   # w_qkv
            pl.BlockSpec((None, 1, H3),          lambda b, l: (l, 0, 0)),   # b_qkv
            pl.BlockSpec((None, HIDDEN, HIDDEN), lambda b, l: (l, 0, 0)),   # w_out
            pl.BlockSpec((None, 1, HIDDEN),      lambda b, l: (l, 0, 0)),   # b_out
            pl.BlockSpec((None, HIDDEN, MLP),    lambda b, l: (l, 0, 0)),   # w_fc1
            pl.BlockSpec((None, 1, MLP),         lambda b, l: (l, 0, 0)),   # b_fc1
            pl.BlockSpec((None, MLP, HIDDEN),    lambda b, l: (l, 0, 0)),   # w_fc2
            pl.BlockSpec((None, 1, HIDDEN),      lambda b, l: (l, 0, 0)),   # b_fc2
        ],
        out_specs=pl.BlockSpec((None, SEQ, HIDDEN), lambda b, l: (b, 0, 0)),
    )

    # Advisory cost estimate for XLA's scheduler.
    mm_flops = 2 * SEQ * HIDDEN * (3 * HIDDEN + HIDDEN + 2 * MLP)
    attn_flops = 2 * 2 * HEADS * SEQ * SEQ * HEAD_DIM
    flops = B * (2 * SEQ * PATCH_DIM * HIDDEN + LAYERS * (mm_flops + attn_flops))
    transcendentals = B * LAYERS * (HEADS * SEQ * SEQ + SEQ * MLP)
    w_bytes = 2 * (PATCH_DIM * HIDDEN
                   + LAYERS * (HIDDEN * (3 * HIDDEN + HIDDEN + MLP) + MLP * HIDDEN))
    b_bytes = 4 * (SEQ * HIDDEN + 2 * HIDDEN
                   + LAYERS * (3 * HIDDEN + HIDDEN + MLP + HIDDEN + 4 * HIDDEN))
    act_bytes = B * SEQ * (2 * PATCH_DIM + 4 * HIDDEN)
    cost = pl.CostEstimate(flops=flops, transcendentals=transcendentals,
                           bytes_accessed=B * (w_bytes + b_bytes) + act_bytes)

    out = pl.pallas_call(
        _clip_encoder_kernel,
        out_shape=jax.ShapeDtypeStruct((B, SEQ, HIDDEN), jnp.float32),
        grid_spec=grid_spec,
        compiler_params=pltpu.CompilerParams(
            dimension_semantics=("parallel", "arbitrary"),
            vmem_limit_bytes=48 * 1024 * 1024),
        cost_estimate=cost,
    )(x_aug, emb_bias, params["w_patch"], params["pre_ln_w"], params["pre_ln_b"],
      params["ln_w"], params["ln_b"],
      params["w_qkv"], params["b_qkv"], params["w_out"], params["b_out"],
      params["w_fc1"], params["b_fc1"], params["w_fc2"], params["b_fc2"])

    return out


def get_cls_features(images, params):
    return clip_encoder_forward(images, params)[:, 0, :]


def get_pooled_features(images, params, pool_type="mean"):
    feats = clip_encoder_forward(images, params)
    if pool_type == "mean":
        return feats.mean(axis=1)
    elif pool_type == "max":
        return feats.max(axis=1)
    return feats[:, 0, :]

# TODO(synk): get_attention_maps (output_attentions=True) is not exposed; the fused
# kernel does not materialize per-head attention probabilities as an output.


# ---------------- pure-JAX reference (for correctness check) ----------------
def _reference_forward(images, params):
    f32 = jnp.float32
    B = images.shape[0]
    patches = _extract_patches(images)
    pe = patches @ params["w_patch"].astype(f32)          # (B, P, H)
    cls = jnp.broadcast_to(params["cls"][None, None, :], (B, 1, HIDDEN))
    h = jnp.concatenate([cls, pe], axis=1) + params["pos"][None]

    def ln(x, w, b):
        mu = x.mean(-1, keepdims=True)
        var = ((x - mu) ** 2).mean(-1, keepdims=True)
        return (x - mu) / jnp.sqrt(var + EPS) * w + b

    h = ln(h, params["pre_ln_w"][0], params["pre_ln_b"][0])
    for li in range(LAYERS):
        hn = ln(h, params["ln_w"][li, 0], params["ln_b"][li, 0])
        qkv = hn @ params["w_qkv"][li].astype(f32) + params["b_qkv"][li]
        q, k, v = jnp.split(qkv, 3, axis=-1)
        q = q.reshape(B, SEQ, HEADS, HEAD_DIM).transpose(0, 2, 1, 3) * SCALE
        k = k.reshape(B, SEQ, HEADS, HEAD_DIM).transpose(0, 2, 1, 3)
        v = v.reshape(B, SEQ, HEADS, HEAD_DIM).transpose(0, 2, 1, 3)
        s = q @ k.transpose(0, 1, 3, 2)
        p = jax.nn.softmax(s, axis=-1)
        ctx = (p @ v).transpose(0, 2, 1, 3).reshape(B, SEQ, HIDDEN)
        h = h + ctx @ params["w_out"][li].astype(f32) + params["b_out"][li]
        hn = ln(h, params["ln_w"][li, 1], params["ln_b"][li, 1])
        hn = hn @ params["w_fc1"][li].astype(f32) + params["b_fc1"][li]
        hn = hn * jax.nn.sigmoid(1.702 * hn)
        h = h + hn @ params["w_fc2"][li].astype(f32) + params["b_fc2"][li]
    return h


if __name__ == "__main__":
    key = jax.random.PRNGKey(0)
    pkey, xkey = jax.random.split(key)
    params = init_params(pkey)
    images = jax.random.normal(xkey, (BATCH, CH, IMG, IMG), dtype=jnp.float32)

    out = clip_encoder_forward(images, params)
    out = jax.block_until_ready(out)
    assert out.shape == (BATCH, SEQ, HIDDEN), out.shape
    assert bool(jnp.all(jnp.isfinite(out)))

    with jax.default_matmul_precision("highest"):
        ref = _reference_forward(images, params)
    max_err = float(jnp.max(jnp.abs(out - ref)))
    assert jnp.allclose(out, ref, atol=2e-2, rtol=2e-2), max_err

    print("KERNEL_OK")
</pallas_src>

<mosaic_0001>
module attributes {stable_mosaic.version = 11 : i64} {
  func.func @_clip_encoder_kernel(%arg0: i32, %arg1: i32, %arg2: memref<1x5x192xbf16, #tpu.memory_space<vmem>>, %arg3: memref<5x32xf32, #tpu.memory_space<vmem>>, %arg4: memref<192x32xbf16, #tpu.memory_space<vmem>>, %arg5: memref<1x32xf32, #tpu.memory_space<vmem>>, %arg6: memref<1x32xf32, #tpu.memory_space<vmem>>, %arg7: memref<1x2x32xf32, #tpu.memory_space<vmem>>, %arg8: memref<1x2x32xf32, #tpu.memory_space<vmem>>, %arg9: memref<1x32x96xbf16, #tpu.memory_space<vmem>>, %arg10: memref<1x1x96xf32, #tpu.memory_space<vmem>>, %arg11: memref<1x32x32xbf16, #tpu.memory_space<vmem>>, %arg12: memref<1x1x32xf32, #tpu.memory_space<vmem>>, %arg13: memref<1x32x64xbf16, #tpu.memory_space<vmem>>, %arg14: memref<1x1x64xf32, #tpu.memory_space<vmem>>, %arg15: memref<1x64x32xbf16, #tpu.memory_space<vmem>>, %arg16: memref<1x1x32xf32, #tpu.memory_space<vmem>>, %arg17: memref<1x5x32xf32, #tpu.memory_space<vmem>>) attributes {dimension_semantics = [#tpu.dimension_semantics<parallel>, #tpu.dimension_semantics<arbitrary>], iteration_bounds = array<i64: 2, 2>, scalar_prefetch = 0 : i64, scratch_operands = 0 : i64, tpu.core_type = #tpu.core_type<tc>, window_params = [{transform_indices = @transform_0, window_bounds = array<i64: 1, 5, 192>}, {pipeline_mode = #tpu.pipeline_mode<synchronous>, transform_indices = @transform_1, window_bounds = array<i64: 5, 32>}, {pipeline_mode = #tpu.pipeline_mode<synchronous>, transform_indices = @transform_2, window_bounds = array<i64: 192, 32>}, {pipeline_mode = #tpu.pipeline_mode<synchronous>, transform_indices = @transform_3, window_bounds = array<i64: 1, 32>}, {pipeline_mode = #tpu.pipeline_mode<synchronous>, transform_indices = @transform_4, window_bounds = array<i64: 1, 32>}, {transform_indices = @transform_5, window_bounds = array<i64: 1, 2, 32>}, {transform_indices = @transform_6, window_bounds = array<i64: 1, 2, 32>}, {transform_indices = @transform_7, window_bounds = array<i64: 1, 32, 96>}, {transform_indices = @transform_8, window_bounds = array<i64: 1, 1, 96>}, {transform_indices = @transform_9, window_bounds = array<i64: 1, 32, 32>}, {transform_indices = @transform_10, window_bounds = array<i64: 1, 1, 32>}, {transform_indices = @transform_11, window_bounds = array<i64: 1, 32, 64>}, {transform_indices = @transform_12, window_bounds = array<i64: 1, 1, 64>}, {transform_indices = @transform_13, window_bounds = array<i64: 1, 64, 32>}, {transform_indices = @transform_14, window_bounds = array<i64: 1, 1, 32>}, {transform_indices = @transform_15, window_bounds = array<i64: 1, 5, 32>}]} {
    %c0_i32 = arith.constant 0 : i32
    %0 = arith.cmpi eq, %arg1, %c0_i32 : i32
    %1 = arith.extui %0 : i1 to i32
    %c0_i32_0 = arith.constant 0 : i32
    %2 = arith.cmpi ne, %1, %c0_i32_0 : i32
    scf.if %2 {
      %c0_68 = arith.constant 0 : index
      %c0_69 = arith.constant 0 : index
      %c0_70 = arith.constant 0 : index
      %175 = vector.load %arg2[%c0_68, %c0_69, %c0_70] : memref<1x5x192xbf16, #tpu.memory_space<vmem>>, vector<1x5x192xbf16>
      %176 = vector.shape_cast %175 : vector<1x5x192xbf16> to vector<5x192xbf16>
      %c0_71 = arith.constant 0 : index
      %c0_72 = arith.constant 0 : index
      %177 = vector.load %arg4[%c0_71, %c0_72] : memref<192x32xbf16, #tpu.memory_space<vmem>>, vector<192x32xbf16>
      %cst_73 = arith.constant dense<0.000000e+00> : vector<5x32xf32>
      %178 = tpu.matmul %176, %177, %cst_73 {dimension_numbers = #tpu.dot_dimension_numbers<[1], [0], [0], [1], [0, 0, 1, 1], [], []>} : vector<5x192xbf16>, vector<192x32xbf16>, vector<5x32xf32> -> vector<5x32xf32>
      %c0_74 = arith.constant 0 : index
      %c0_75 = arith.constant 0 : index
      %179 = vector.load %arg3[%c0_74, %c0_75] : memref<5x32xf32, #tpu.memory_space<vmem>>, vector<5x32xf32>
      %180 = arith.addf %178, %179 : vector<5x32xf32>
      %c0_76 = arith.constant 0 : index
      %c0_77 = arith.constant 0 : index
      %181 = vector.load %arg5[%c0_76, %c0_77] : memref<1x32xf32, #tpu.memory_space<vmem>>, vector<1x32xf32>
      %c0_78 = arith.constant 0 : index
      %c0_79 = arith.constant 0 : index
      %182 = vector.load %arg6[%c0_78, %c0_79] : memref<1x32xf32, #tpu.memory_space<vmem>>, vector<1x32xf32>
      %cst_80 = arith.constant dense<0.000000e+00> : vector<5xf32>
      %183 = vector.multi_reduction <add>, %180, %cst_80 [1] : vector<5x32xf32> to vector<5xf32>
      %184 = vector.shape_cast %183 : vector<5xf32> to vector<5x1xf32>
      %cst_81 = arith.constant 3.200000e+01 : f32
      %185 = vector.broadcast %cst_81 : f32 to vector<5x1xf32>
      %186 = arith.divf %184, %185 : vector<5x1xf32>
      %187 = vector.broadcast %186 : vector<5x1xf32> to vector<5x32xf32>
      %188 = arith.subf %180, %187 : vector<5x32xf32>
      %189 = arith.mulf %188, %188 : vector<5x32xf32>
      %cst_82 = arith.constant dense<0.000000e+00> : vector<5xf32>
      %190 = vector.multi_reduction <add>, %189, %cst_82 [1] : vector<5x32xf32> to vector<5xf32>
      %191 = vector.shape_cast %190 : vector<5xf32> to vector<5x1xf32>
      %cst_83 = arith.constant 3.200000e+01 : f32
      %192 = vector.broadcast %cst_83 : f32 to vector<5x1xf32>
      %193 = arith.divf %191, %192 : vector<5x1xf32>
      %194 = vector.broadcast %186 : vector<5x1xf32> to vector<5x32xf32>
      %195 = arith.subf %180, %194 : vector<5x32xf32>
      %cst_84 = arith.constant 9.99999974E-6 : f32
      %196 = vector.broadcast %cst_84 : f32 to vector<5x1xf32>
      %197 = arith.addf %193, %196 : vector<5x1xf32>
      %198 = math.rsqrt %197 : vector<5x1xf32>
      %199 = vector.broadcast %198 : vector<5x1xf32> to vector<5x32xf32>
      %200 = arith.mulf %195, %199 : vector<5x32xf32>
      %201 = vector.broadcast %181 : vector<1x32xf32> to vector<5x32xf32>
      %202 = arith.mulf %200, %201 : vector<5x32xf32>
      %203 = vector.broadcast %182 : vector<1x32xf32> to vector<5x32xf32>
      %204 = arith.addf %202, %203 : vector<5x32xf32>
      %c0_85 = arith.constant 0 : index
      %c0_86 = arith.constant 0 : index
      %c0_87 = arith.constant 0 : index
      %205 = vector.load %arg17[%c0_85, %c0_86, %c0_87] : memref<1x5x32xf32, #tpu.memory_space<vmem>>, vector<1x5x32xf32>
      %206 = vector.shape_cast %205 : vector<1x5x32xf32> to vector<5x32xf32>
      %207 = vector.shape_cast %204 : vector<5x32xf32> to vector<1x5x32xf32>
      tpu.vector_store %arg17[%c0_85, %c0_86, %c0_87], %207 {strides = array<i32>} : memref<1x5x32xf32, #tpu.memory_space<vmem>>, vector<1x5x32xf32>,
    } else {
    }
    %c0 = arith.constant 0 : index
    %c0_1 = arith.constant 0 : index
    %c0_2 = arith.constant 0 : index
    %3 = vector.load %arg17[%c0, %c0_1, %c0_2] : memref<1x5x32xf32, #tpu.memory_space<vmem>>, vector<1x5x32xf32>
    %4 = vector.shape_cast %3 : vector<1x5x32xf32> to vector<5x32xf32>
    %c0_3 = arith.constant 0 : index
    %c0_4 = arith.constant 0 : index
    %c0_5 = arith.constant 0 : index
    %5 = vector.load %arg7[%c0_3, %c0_4, %c0_5] : memref<1x2x32xf32, #tpu.memory_space<vmem>>, vector<1x2x32xf32>
    %6 = vector.shape_cast %5 : vector<1x2x32xf32> to vector<2x32xf32>
    %c0_6 = arith.constant 0 : index
    %c0_7 = arith.constant 0 : index
    %c0_8 = arith.constant 0 : index
    %7 = vector.load %arg8[%c0_6, %c0_7, %c0_8] : memref<1x2x32xf32, #tpu.memory_space<vmem>>, vector<1x2x32xf32>
    %8 = vector.shape_cast %7 : vector<1x2x32xf32> to vector<2x32xf32>
    %9 = vector.extract_strided_slice %6 {offsets = [0, 0], sizes = [1, 32], strides = [1, 1]} : vector<2x32xf32> to vector<1x32xf32>
    %10 = vector.extract_strided_slice %8 {offsets = [0, 0], sizes = [1, 32], strides = [1, 1]} : vector<2x32xf32> to vector<1x32xf32>
    %cst = arith.constant dense<0.000000e+00> : vector<5xf32>
    %11 = vector.multi_reduction <add>, %4, %cst [1] : vector<5x32xf32> to vector<5xf32>
    %12 = vector.shape_cast %11 : vector<5xf32> to vector<5x1xf32>
    %cst_9 = arith.constant 3.200000e+01 : f32
    %13 = vector.broadcast %cst_9 : f32 to vector<5x1xf32>
    %14 = arith.divf %12, %13 : vector<5x1xf32>
    %15 = vector.broadcast %14 : vector<5x1xf32> to vector<5x32xf32>
    %16 = arith.subf %4, %15 : vector<5x32xf32>
    %17 = arith.mulf %16, %16 : vector<5x32xf32>
    %cst_10 = arith.constant dense<0.000000e+00> : vector<5xf32>
    %18 = vector.multi_reduction <add>, %17, %cst_10 [1] : vector<5x32xf32> to vector<5xf32>
    %19 = vector.shape_cast %18 : vector<5xf32> to vector<5x1xf32>
    %cst_11 = arith.constant 3.200000e+01 : f32
    %20 = vector.broadcast %cst_11 : f32 to vector<5x1xf32>
    %21 = arith.divf %19, %20 : vector<5x1xf32>
    %22 = vector.broadcast %14 : vector<5x1xf32> to vector<5x32xf32>
    %23 = arith.subf %4, %22 : vector<5x32xf32>
    %cst_12 = arith.constant 9.99999974E-6 : f32
    %24 = vector.broadcast %cst_12 : f32 to vector<5x1xf32>
    %25 = arith.addf %21, %24 : vector<5x1xf32>
    %26 = math.rsqrt %25 : vector<5x1xf32>
    %27 = vector.broadcast %26 : vector<5x1xf32> to vector<5x32xf32>
    %28 = arith.mulf %23, %27 : vector<5x32xf32>
    %29 = vector.broadcast %9 : vector<1x32xf32> to vector<5x32xf32>
    %30 = arith.mulf %28, %29 : vector<5x32xf32>
    %31 = vector.broadcast %10 : vector<1x32xf32> to vector<5x32xf32>
    %32 = arith.addf %30, %31 : vector<5x32xf32>
    %33 = arith.truncf %32 : vector<5x32xf32> to vector<5x32xbf16>
    %c0_13 = arith.constant 0 : index
    %c0_14 = arith.constant 0 : index
    %c0_15 = arith.constant 0 : index
    %34 = vector.load %arg9[%c0_13, %c0_14, %c0_15] : memref<1x32x96xbf16, #tpu.memory_space<vmem>>, vector<1x32x96xbf16>
    %35 = vector.shape_cast %34 : vector<1x32x96xbf16> to vector<32x96xbf16>
    %cst_16 = arith.constant dense<0.000000e+00> : vector<5x96xf32>
    %36 = tpu.matmul %33, %35, %cst_16 {dimension_numbers = #tpu.dot_dimension_numbers<[1], [0], [0], [1], [0, 0, 1, 1], [], []>} : vector<5x32xbf16>, vector<32x96xbf16>, vector<5x96xf32> -> vector<5x96xf32>
    %c0_17 = arith.constant 0 : index
    %c0_18 = arith.constant 0 : index
    %c0_19 = arith.constant 0 : index
    %37 = vector.load %arg10[%c0_17, %c0_18, %c0_19] : memref<1x1x96xf32, #tpu.memory_space<vmem>>, vector<1x1x96xf32>
    %38 = vector.shape_cast %37 : vector<1x1x96xf32> to vector<1x96xf32>
    %39 = vector.broadcast %38 : vector<1x96xf32> to vector<5x96xf32>
    %40 = arith.addf %36, %39 : vector<5x96xf32>
    %41 = vector.extract_strided_slice %40 {offsets = [0, 0], sizes = [5, 32], strides = [1, 1]} : vector<5x96xf32> to vector<5x32xf32>
    %cst_20 = arith.constant 0.353553385 : f32
    %42 = vector.broadcast %cst_20 : f32 to vector<5x32xf32>
    %43 = arith.mulf %41, %42 : vector<5x32xf32>
    %44 = arith.truncf %43 : vector<5x32xf32> to vector<5x32xbf16>
    %45 = vector.extract_strided_slice %40 {offsets = [0, 32], sizes = [5, 32], strides = [1, 1]} : vector<5x96xf32> to vector<5x32xf32>
    %46 = arith.truncf %45 : vector<5x32xf32> to vector<5x32xbf16>
    %47 = vector.extract_strided_slice %40 {offsets = [0, 64], sizes = [5, 32], strides = [1, 1]} : vector<5x96xf32> to vector<5x32xf32>
    %48 = arith.truncf %47 : vector<5x32xf32> to vector<5x32xbf16>
    %49 = vector.extract_strided_slice %44 {offsets = [0, 0], sizes = [5, 8], strides = [1, 1]} : vector<5x32xbf16> to vector<5x8xbf16>
    %50 = vector.extract_strided_slice %46 {offsets = [0, 0], sizes = [5, 8], strides = [1, 1]} : vector<5x32xbf16> to vector<5x8xbf16>
    "tpu.trace_start"() <{level = 10 : i32, message = "qd,kd->qk"}> : () -> ()
    %cst_21 = arith.constant dense<0.000000e+00> : vector<5x5xf32>
    %51 = tpu.matmul %49, %50, %cst_21 {dimension_numbers = #tpu.dot_dimension_numbers<[1], [1], [0], [0], [0, 0, 1, 0], [], []>} : vector<5x8xbf16>, vector<5x8xbf16>, vector<5x5xf32> -> vector<5x5xf32>
    "tpu.trace_stop"() : () -> ()
    %cst_22 = arith.constant dense<0xFF800000> : vector<5xf32>
    %52 = vector.multi_reduction <maximumf>, %51, %cst_22 [1] : vector<5x5xf32> to vector<5xf32>
    %53 = vector.shape_cast %52 : vector<5xf32> to vector<5x1xf32>
    %54 = vector.broadcast %53 : vector<5x1xf32> to vector<5x5xf32>
    %55 = arith.subf %51, %54 : vector<5x5xf32>
    %56 = math.exp %55 : vector<5x5xf32>
    %cst_23 = arith.constant dense<0.000000e+00> : vector<5xf32>
    %57 = vector.multi_reduction <add>, %56, %cst_23 [1] : vector<5x5xf32> to vector<5xf32>
    %58 = vector.shape_cast %57 : vector<5xf32> to vector<5x1xf32>
    %59 = tpu.reciprocal %58 {approx = true} : vector<5x1xf32> -> vector<5x1xf32>
    %60 = vector.broadcast %59 : vector<5x1xf32> to vector<5x5xf32>
    %61 = arith.mulf %56, %60 : vector<5x5xf32>
    %62 = arith.truncf %61 : vector<5x5xf32> to vector<5x5xbf16>
    %63 = vector.extract_strided_slice %48 {offsets = [0, 0], sizes = [5, 8], strides = [1, 1]} : vector<5x32xbf16> to vector<5x8xbf16>
    %cst_24 = arith.constant dense<0.000000e+00> : vector<5x8xf32>
    %64 = tpu.matmul %62, %63, %cst_24 {dimension_numbers = #tpu.dot_dimension_numbers<[1], [0], [0], [1], [0, 0, 1, 1], [], []>} : vector<5x5xbf16>, vector<5x8xbf16>, vector<5x8xf32> -> vector<5x8xf32>
    %65 = vector.extract_strided_slice %44 {offsets = [0, 8], sizes = [5, 8], strides = [1, 1]} : vector<5x32xbf16> to vector<5x8xbf16>
    %66 = vector.extract_strided_slice %46 {offsets = [0, 8], sizes = [5, 8], strides = [1, 1]} : vector<5x32xbf16> to vector<5x8xbf16>
    "tpu.trace_start"() <{level = 10 : i32, message = "qd,kd->qk"}> : () -> ()
    %cst_25 = arith.constant dense<0.000000e+00> : vector<5x5xf32>
    %67 = tpu.matmul %65, %66, %cst_25 {dimension_numbers = #tpu.dot_dimension_numbers<[1], [1], [0], [0], [0, 0, 1, 0], [], []>} : vector<5x8xbf16>, vector<5x8xbf16>, vector<5x5xf32> -> vector<5x5xf32>
    "tpu.trace_stop"() : () -> ()
    %cst_26 = arith.constant dense<0xFF800000> : vector<5xf32>
    %68 = vector.multi_reduction <maximumf>, %67, %cst_26 [1] : vector<5x5xf32> to vector<5xf32>
    %69 = vector.shape_cast %68 : vector<5xf32> to vector<5x1xf32>
    %70 = vector.broadcast %69 : vector<5x1xf32> to vector<5x5xf32>
    %71 = arith.subf %67, %70 : vector<5x5xf32>
    %72 = math.exp %71 : vector<5x5xf32>
    %cst_27 = arith.constant dense<0.000000e+00> : vector<5xf32>
    %73 = vector.multi_reduction <add>, %72, %cst_27 [1] : vector<5x5xf32> to vector<5xf32>
    %74 = vector.shape_cast %73 : vector<5xf32> to vector<5x1xf32>
    %75 = tpu.reciprocal %74 {approx = true} : vector<5x1xf32> -> vector<5x1xf32>
    %76 = vector.broadcast %75 : vector<5x1xf32> to vector<5x5xf32>
    %77 = arith.mulf %72, %76 : vector<5x5xf32>
    %78 = arith.truncf %77 : vector<5x5xf32> to vector<5x5xbf16>
    %79 = vector.extract_strided_slice %48 {offsets = [0, 8], sizes = [5, 8], strides = [1, 1]} : vector<5x32xbf16> to vector<5x8xbf16>
    %cst_28 = arith.constant dense<0.000000e+00> : vector<5x8xf32>
    %80 = tpu.matmul %78, %79, %cst_28 {dimension_numbers = #tpu.dot_dimension_numbers<[1], [0], [0], [1], [0, 0, 1, 1], [], []>} : vector<5x5xbf16>, vector<5x8xbf16>, vector<5x8xf32> -> vector<5x8xf32>
    %81 = vector.extract_strided_slice %44 {offsets = [0, 16], sizes = [5, 8], strides = [1, 1]} : vector<5x32xbf16> to vector<5x8xbf16>
    %82 = vector.extract_strided_slice %46 {offsets = [0, 16], sizes = [5, 8], strides = [1, 1]} : vector<5x32xbf16> to vector<5x8xbf16>
    "tpu.trace_start"() <{level = 10 : i32, message = "qd,kd->qk"}> : () -> ()
    %cst_29 = arith.constant dense<0.000000e+00> : vector<5x5xf32>
    %83 = tpu.matmul %81, %82, %cst_29 {dimension_numbers = #tpu.dot_dimension_numbers<[1], [1], [0], [0], [0, 0, 1, 0], [], []>} : vector<5x8xbf16>, vector<5x8xbf16>, vector<5x5xf32> -> vector<5x5xf32>
    "tpu.trace_stop"() : () -> ()
    %cst_30 = arith.constant dense<0xFF800000> : vector<5xf32>
    %84 = vector.multi_reduction <maximumf>, %83, %cst_30 [1] : vector<5x5xf32> to vector<5xf32>
    %85 = vector.shape_cast %84 : vector<5xf32> to vector<5x1xf32>
    %86 = vector.broadcast %85 : vector<5x1xf32> to vector<5x5xf32>
    %87 = arith.subf %83, %86 : vector<5x5xf32>
    %88 = math.exp %87 : vector<5x5xf32>
    %cst_31 = arith.constant dense<0.000000e+00> : vector<5xf32>
    %89 = vector.multi_reduction <add>, %88, %cst_31 [1] : vector<5x5xf32> to vector<5xf32>
    %90 = vector.shape_cast %89 : vector<5xf32> to vector<5x1xf32>
    %91 = tpu.reciprocal %90 {approx = true} : vector<5x1xf32> -> vector<5x1xf32>
    %92 = vector.broadcast %91 : vector<5x1xf32> to vector<5x5xf32>
    %93 = arith.mulf %88, %92 : vector<5x5xf32>
    %94 = arith.truncf %93 : vector<5x5xf32> to vector<5x5xbf16>
    %95 = vector.extract_strided_slice %48 {offsets = [0, 16], sizes = [5, 8], strides = [1, 1]} : vector<5x32xbf16> to vector<5x8xbf16>
    %cst_32 = arith.constant dense<0.000000e+00> : vector<5x8xf32>
    %96 = tpu.matmul %94, %95, %cst_32 {dimension_numbers = #tpu.dot_dimension_numbers<[1], [0], [0], [1], [0, 0, 1, 1], [], []>} : vector<5x5xbf16>, vector<5x8xbf16>, vector<5x8xf32> -> vector<5x8xf32>
    %97 = vector.extract_strided_slice %44 {offsets = [0, 24], sizes = [5, 8], strides = [1, 1]} : vector<5x32xbf16> to vector<5x8xbf16>
    %98 = vector.extract_strided_slice %46 {offsets = [0, 24], sizes = [5, 8], strides = [1, 1]} : vector<5x32xbf16> to vector<5x8xbf16>
    "tpu.trace_start"() <{level = 10 : i32, message = "qd,kd->qk"}> : () -> ()
    %cst_33 = arith.constant dense<0.000000e+00> : vector<5x5xf32>
    %99 = tpu.matmul %97, %98, %cst_33 {dimension_numbers = #tpu.dot_dimension_numbers<[1], [1], [0], [0], [0, 0, 1, 0], [], []>} : vector<5x8xbf16>, vector<5x8xbf16>, vector<5x5xf32> -> vector<5x5xf32>
    "tpu.trace_stop"() : () -> ()
    %cst_34 = arith.constant dense<0xFF800000> : vector<5xf32>
    %100 = vector.multi_reduction <maximumf>, %99, %cst_34 [1] : vector<5x5xf32> to vector<5xf32>
    %101 = vector.shape_cast %100 : vector<5xf32> to vector<5x1xf32>
    %102 = vector.broadcast %101 : vector<5x1xf32> to vector<5x5xf32>
    %103 = arith.subf %99, %102 : vector<5x5xf32>
    %104 = math.exp %103 : vector<5x5xf32>
    %cst_35 = arith.constant dense<0.000000e+00> : vector<5xf32>
    %105 = vector.multi_reduction <add>, %104, %cst_35 [1] : vector<5x5xf32> to vector<5xf32>
    %106 = vector.shape_cast %105 : vector<5xf32> to vector<5x1xf32>
    %107 = tpu.reciprocal %106 {approx = true} : vector<5x1xf32> -> vector<5x1xf32>
    %108 = vector.broadcast %107 : vector<5x1xf32> to vector<5x5xf32>
    %109 = arith.mulf %104, %108 : vector<5x5xf32>
    %110 = arith.truncf %109 : vector<5x5xf32> to vector<5x5xbf16>
    %111 = vector.extract_strided_slice %48 {offsets = [0, 24], sizes = [5, 8], strides = [1, 1]} : vector<5x32xbf16> to vector<5x8xbf16>
    %cst_36 = arith.constant dense<0.000000e+00> : vector<5x8xf32>
    %112 = tpu.matmul %110, %111, %cst_36 {dimension_numbers = #tpu.dot_dimension_numbers<[1], [0], [0], [1], [0, 0, 1, 1], [], []>} : vector<5x5xbf16>, vector<5x8xbf16>, vector<5x8xf32> -> vector<5x8xf32>
    %113 = tpu.concatenate %64, %80, %96, %112 in 1 : vector<5x8xf32>, vector<5x8xf32>, vector<5x8xf32>, vector<5x8xf32> -> vector<5x32xf32>
    %114 = arith.truncf %113 : vector<5x32xf32> to vector<5x32xbf16>
    %c0_37 = arith.constant 0 : index
    %c0_38 = arith.constant 0 : index
    %c0_39 = arith.constant 0 : index
    %115 = vector.load %arg11[%c0_37, %c0_38, %c0_39] : memref<1x32x32xbf16, #tpu.memory_space<vmem>>, vector<1x32x32xbf16>
    %116 = vector.shape_cast %115 : vector<1x32x32xbf16> to vector<32x32xbf16>
    %cst_40 = arith.constant dense<0.000000e+00> : vector<5x32xf32>
    %117 = tpu.matmul %114, %116, %cst_40 {dimension_numbers = #tpu.dot_dimension_numbers<[1], [0], [0], [1], [0, 0, 1, 1], [], []>} : vector<5x32xbf16>, vector<32x32xbf16>, vector<5x32xf32> -> vector<5x32xf32>
    %118 = arith.addf %4, %117 : vector<5x32xf32>
    %c0_41 = arith.constant 0 : index
    %c0_42 = arith.constant 0 : index
    %c0_43 = arith.constant 0 : index
    %119 = vector.load %arg12[%c0_41, %c0_42, %c0_43] : memref<1x1x32xf32, #tpu.memory_space<vmem>>, vector<1x1x32xf32>
    %120 = vector.shape_cast %119 : vector<1x1x32xf32> to vector<1x32xf32>
    %121 = vector.broadcast %120 : vector<1x32xf32> to vector<5x32xf32>
    %122 = arith.addf %118, %121 : vector<5x32xf32>
    %123 = vector.extract_strided_slice %6 {offsets = [1, 0], sizes = [1, 32], strides = [1, 1]} : vector<2x32xf32> to vector<1x32xf32>
    %124 = vector.extract_strided_slice %8 {offsets = [1, 0], sizes = [1, 32], strides = [1, 1]} : vector<2x32xf32> to vector<1x32xf32>
    %cst_44 = arith.constant dense<0.000000e+00> : vector<5xf32>
    %125 = vector.multi_reduction <add>, %122, %cst_44 [1] : vector<5x32xf32> to vector<5xf32>
    %126 = vector.shape_cast %125 : vector<5xf32> to vector<5x1xf32>
    %cst_45 = arith.constant 3.200000e+01 : f32
    %127 = vector.broadcast %cst_45 : f32 to vector<5x1xf32>
    %128 = arith.divf %126, %127 : vector<5x1xf32>
    %129 = vector.broadcast %128 : vector<5x1xf32> to vector<5x32xf32>
    %130 = arith.subf %122, %129 : vector<5x32xf32>
    %131 = arith.mulf %130, %130 : vector<5x32xf32>
    %cst_46 = arith.constant dense<0.000000e+00> : vector<5xf32>
    %132 = vector.multi_reduction <add>, %131, %cst_46 [1] : vector<5x32xf32> to vector<5xf32>
    %133 = vector.shape_cast %132 : vector<5xf32> to vector<5x1xf32>
    %cst_47 = arith.constant 3.200000e+01 : f32
    %134 = vector.broadcast %cst_47 : f32 to vector<5x1xf32>
    %135 = arith.divf %133, %134 : vector<5x1xf32>
    %136 = vector.broadcast %128 : vector<5x1xf32> to vector<5x32xf32>
    %137 = arith.subf %122, %136 : vector<5x32xf32>
    %cst_48 = arith.constant 9.99999974E-6 : f32
    %138 = vector.broadcast %cst_48 : f32 to vector<5x1xf32>
    %139 = arith.addf %135, %138 : vector<5x1xf32>
    %140 = math.rsqrt %139 : vector<5x1xf32>
    %141 = vector.broadcast %140 : vector<5x1xf32> to vector<5x32xf32>
    %142 = arith.mulf %137, %141 : vector<5x32xf32>
    %143 = vector.broadcast %123 : vector<1x32xf32> to vector<5x32xf32>
    %144 = arith.mulf %142, %143 : vector<5x32xf32>
    %145 = vector.broadcast %124 : vector<1x32xf32> to vector<5x32xf32>
    %146 = arith.addf %144, %145 : vector<5x32xf32>
    %147 = arith.truncf %146 : vector<5x32xf32> to vector<5x32xbf16>
    %c0_49 = arith.constant 0 : index
    %c0_50 = arith.constant 0 : index
    %c0_51 = arith.constant 0 : index
    %148 = vector.load %arg13[%c0_49, %c0_50, %c0_51] : memref<1x32x64xbf16, #tpu.memory_space<vmem>>, vector<1x32x64xbf16>
    %149 = vector.shape_cast %148 : vector<1x32x64xbf16> to vector<32x64xbf16>
    %cst_52 = arith.constant dense<0.000000e+00> : vector<5x64xf32>
    %150 = tpu.matmul %147, %149, %cst_52 {dimension_numbers = #tpu.dot_dimension_numbers<[1], [0], [0], [1], [0, 0, 1, 1], [], []>} : vector<5x32xbf16>, vector<32x64xbf16>, vector<5x64xf32> -> vector<5x64xf32>
    %c0_53 = arith.constant 0 : index
    %c0_54 = arith.constant 0 : index
    %c0_55 = arith.constant 0 : index
    %151 = vector.load %arg14[%c0_53, %c0_54, %c0_55] : memref<1x1x64xf32, #tpu.memory_space<vmem>>, vector<1x1x64xf32>
    %152 = vector.shape_cast %151 : vector<1x1x64xf32> to vector<1x64xf32>
    %153 = vector.broadcast %152 : vector<1x64xf32> to vector<5x64xf32>
    %154 = arith.addf %150, %153 : vector<5x64xf32>
    %cst_56 = arith.constant 1.702000e+00 : f32
    %155 = vector.broadcast %cst_56 : f32 to vector<5x64xf32>
    %156 = arith.mulf %155, %154 : vector<5x64xf32>
    %157 = arith.negf %156 : vector<5x64xf32>
    %158 = math.exp %157 : vector<5x64xf32>
    %cst_57 = arith.constant 1.000000e+00 : f32
    %159 = vector.broadcast %cst_57 : f32 to vector<5x64xf32>
    %160 = arith.addf %159, %158 : vector<5x64xf32>
    %161 = arith.divf %159, %160 : vector<5x64xf32>
    %162 = arith.mulf %154, %161 : vector<5x64xf32>
    %163 = arith.truncf %162 : vector<5x64xf32> to vector<5x64xbf16>
    %c0_58 = arith.constant 0 : index
    %c0_59 = arith.constant 0 : index
    %c0_60 = arith.constant 0 : index
    %164 = vector.load %arg15[%c0_58, %c0_59, %c0_60] : memref<1x64x32xbf16, #tpu.memory_space<vmem>>, vector<1x64x32xbf16>
    %165 = vector.shape_cast %164 : vector<1x64x32xbf16> to vector<64x32xbf16>
    %cst_61 = arith.constant dense<0.000000e+00> : vector<5x32xf32>
    %166 = tpu.matmul %163, %165, %cst_61 {dimension_numbers = #tpu.dot_dimension_numbers<[1], [0], [0], [1], [0, 0, 1, 1], [], []>} : vector<5x64xbf16>, vector<64x32xbf16>, vector<5x32xf32> -> vector<5x32xf32>
    %167 = arith.addf %122, %166 : vector<5x32xf32>
    %c0_62 = arith.constant 0 : index
    %c0_63 = arith.constant 0 : index
    %c0_64 = arith.constant 0 : index
    %168 = vector.load %arg16[%c0_62, %c0_63, %c0_64] : memref<1x1x32xf32, #tpu.memory_space<vmem>>, vector<1x1x32xf32>
    %169 = vector.shape_cast %168 : vector<1x1x32xf32> to vector<1x32xf32>
    %170 = vector.broadcast %169 : vector<1x32xf32> to vector<5x32xf32>
    %171 = arith.addf %167, %170 : vector<5x32xf32>
    %c0_65 = arith.constant 0 : index
    %c0_66 = arith.constant 0 : index
    %c0_67 = arith.constant 0 : index
    %172 = vector.load %arg17[%c0_65, %c0_66, %c0_67] : memref<1x5x32xf32, #tpu.memory_space<vmem>>, vector<1x5x32xf32>
    %173 = vector.shape_cast %172 : vector<1x5x32xf32> to vector<5x32xf32>
    %174 = vector.shape_cast %171 : vector<5x32xf32> to vector<1x5x32xf32>
    tpu.vector_store %arg17[%c0_65, %c0_66, %c0_67], %174 {strides = array<i32>} : memref<1x5x32xf32, #tpu.memory_space<vmem>>, vector<1x5x32xf32>,
    return
  }
  func.func @transform_0(%arg0: i32, %arg1: i32) -> (i32, i32, i32) {
    %c0_i32 = arith.constant 0 : i32
    %c0_i32_0 = arith.constant 0 : i32
    %c0_i32_1 = arith.constant 0 : i32
    return %arg0, %c0_i32, %c0_i32_0 : i32, i32, i32
  }
  func.func @transform_1(%arg0: i32, %arg1: i32) -> (i32, i32) {
    %c0_i32 = arith.constant 0 : i32
    %c0_i32_0 = arith.constant 0 : i32
    %c0_i32_1 = arith.constant 0 : i32
    return %c0_i32, %c0_i32_0 : i32, i32
  }
  func.func @transform_2(%arg0: i32, %arg1: i32) -> (i32, i32) {
    %c0_i32 = arith.constant 0 : i32
    %c0_i32_0 = arith.constant 0 : i32
    %c0_i32_1 = arith.constant 0 : i32
    return %c0_i32, %c0_i32_0 : i32, i32
  }
  func.func @transform_3(%arg0: i32, %arg1: i32) -> (i32, i32) {
    %c0_i32 = arith.constant 0 : i32
    %c0_i32_0 = arith.constant 0 : i32
    %c0_i32_1 = arith.constant 0 : i32
    return %c0_i32, %c0_i32_0 : i32, i32
  }
  func.func @transform_4(%arg0: i32, %arg1: i32) -> (i32, i32) {
    %c0_i32 = arith.constant 0 : i32
    %c0_i32_0 = arith.constant 0 : i32
    %c0_i32_1 = arith.constant 0 : i32
    return %c0_i32, %c0_i32_0 : i32, i32
  }
  func.func @transform_5(%arg0: i32, %arg1: i32) -> (i32, i32, i32) {
    %c0_i32 = arith.constant 0 : i32
    %c0_i32_0 = arith.constant 0 : i32
    %c0_i32_1 = arith.constant 0 : i32
    return %arg1, %c0_i32, %c0_i32_0 : i32, i32, i32
  }
  func.func @transform_6(%arg0: i32, %arg1: i32) -> (i32, i32, i32) {
    %c0_i32 = arith.constant 0 : i32
    %c0_i32_0 = arith.constant 0 : i32
    %c0_i32_1 = arith.constant 0 : i32
    return %arg1, %c0_i32, %c0_i32_0 : i32, i32, i32
  }
  func.func @transform_7(%arg0: i32, %arg1: i32) -> (i32, i32, i32) {
    %c0_i32 = arith.constant 0 : i32
    %c0_i32_0 = arith.constant 0 : i32
    %c0_i32_1 = arith.constant 0 : i32
    return %arg1, %c0_i32, %c0_i32_0 : i32, i32, i32
  }
  func.func @transform_8(%arg0: i32, %arg1: i32) -> (i32, i32, i32) {
    %c0_i32 = arith.constant 0 : i32
    %c0_i32_0 = arith.constant 0 : i32
    %c0_i32_1 = arith.constant 0 : i32
    return %arg1, %c0_i32, %c0_i32_0 : i32, i32, i32
  }
  func.func @transform_9(%arg0: i32, %arg1: i32) -> (i32, i32, i32) {
    %c0_i32 = arith.constant 0 : i32
    %c0_i32_0 = arith.constant 0 : i32
    %c0_i32_1 = arith.constant 0 : i32
    return %arg1, %c0_i32, %c0_i32_0 : i32, i32, i32
  }
  func.func @transform_10(%arg0: i32, %arg1: i32) -> (i32, i32, i32) {
    %c0_i32 = arith.constant 0 : i32
    %c0_i32_0 = arith.constant 0 : i32
    %c0_i32_1 = arith.constant 0 : i32
    return %arg1, %c0_i32, %c0_i32_0 : i32, i32, i32
  }
  func.func @transform_11(%arg0: i32, %arg1: i32) -> (i32, i32, i32) {
    %c0_i32 = arith.constant 0 : i32
    %c0_i32_0 = arith.constant 0 : i32
    %c0_i32_1 = arith.constant 0 : i32
    return %arg1, %c0_i32, %c0_i32_0 : i32, i32, i32
  }
  func.func @transform_12(%arg0: i32, %arg1: i32) -> (i32, i32, i32) {
    %c0_i32 = arith.constant 0 : i32
    %c0_i32_0 = arith.constant 0 : i32
    %c0_i32_1 = arith.constant 0 : i32
    return %arg1, %c0_i32, %c0_i32_0 : i32, i32, i32
  }
  func.func @transform_13(%arg0: i32, %arg1: i32) -> (i32, i32, i32) {
    %c0_i32 = arith.constant 0 : i32
    %c0_i32_0 = arith.constant 0 : i32
    %c0_i32_1 = arith.constant 0 : i32
    return %arg1, %c0_i32, %c0_i32_0 : i32, i32, i32
  }
  func.func @transform_14(%arg0: i32, %arg1: i32) -> (i32, i32, i32) {
    %c0_i32 = arith.constant 0 : i32
    %c0_i32_0 = arith.constant 0 : i32
    %c0_i32_1 = arith.constant 0 : i32
    return %arg1, %c0_i32, %c0_i32_0 : i32, i32, i32
  }
  func.func @transform_15(%arg0: i32, %arg1: i32) -> (i32, i32, i32) {
    %c0_i32 = arith.constant 0 : i32
    %c0_i32_0 = arith.constant 0 : i32
    %c0_i32_1 = arith.constant 0 : i32
    return %arg0, %c0_i32, %c0_i32_0 : i32, i32, i32
  }
}

</mosaic_0001>

<bundles_post_ra>
// kernel: clip_encoder_forward.1
= control target key start
LH: loop header
LB: loop body
LE: loop exit
PB: predicated region body
PF: predicated region fallthrough
CT: control target
= control target key end

     0   :  { %s2279_s18 = smov 0   ;;  %s2281_s19 = smov 0   ;;  %s2563_s0 = inlined_call_operand.vmem [shape: bf16[2,5,192], index: 0, kind: input, shape index: {}]   ;;  %s2564_s1 = inlined_call_operand.vmem [shape: f32[5,32], index: 1, kind: input, shape index: {}]   ;;  %s2565_s2 = inlined_call_operand.vmem [shape: bf16[192,32], index: 2, kind: input, shape index: {}]   ;;  %s2566_s3 = inlined_call_operand.vmem [shape: f32[1,32], index: 3, kind: input, shape index: {}]   ;;  %s2567_s4 = inlined_call_operand.vmem [shape: f32[1,32], index: 4, kind: input, shape index: {}]   ;;  %s2568_s5 = inlined_call_operand.vmem [shape: f32[2,2,32], index: 5, kind: input, shape index: {}]   ;;  %s2569_s6 = inlined_call_operand.vmem [shape: f32[2,2,32], index: 6, kind: input, shape index: {}]   ;;  %s2570_s7 = inlined_call_operand.vmem [shape: bf16[2,32,96], index: 7, kind: input, shape index: {}]   ;;  %s2571_s8 = inlined_call_operand.vmem [shape: f32[2,1,96], index: 8, kind: input, shape index: {}]   ;;  %s2572_s9 = inlined_call_operand.vmem [shape: bf16[2,32,32], index: 9, kind: input, shape index: {}]   ;;  %s2573_s10 = inlined_call_operand.vmem [shape: f32[2,1,32], index: 10, kind: input, shape index: {}]   ;;  %s2574_s11 = inlined_call_operand.vmem [shape: bf16[2,32,64], index: 11, kind: input, shape index: {}]   ;;  %s2575_s12 = inlined_call_operand.vmem [shape: f32[2,1,64], index: 12, kind: input, shape index: {}]   ;;  %s2576_s13 = inlined_call_operand.vmem [shape: bf16[2,64,32], index: 13, kind: input, shape index: {}]   ;;  %s2577_s14 = inlined_call_operand.vmem [shape: f32[2,1,32], index: 14, kind: input, shape index: {}]   ;;  %s2578_s15 = inlined_call_operand.vmem [shape: f32[2,5,32], index: 15, kind: output, shape index: {}]  }
   0x1   :  { %2583 = sst [smem:[#allocation7_spill]] %s2563_s0  ;;  %s2283_s20 = smov 0  }
   0x2   :  { %2584 = sst [smem:[#allocation8_spill]] %s2564_s1  ;;  %s2285_s21 = smov 0  }
   0x3   :  { %2585 = sst [smem:[#allocation9_spill]] %s2565_s2  ;;  %s2287_s22 = smov 0  }
   0x4   :  { %2586 = sst [smem:[#allocation10_spill]] %s2566_s3 }
   0x5   :  { %2587 = sst [smem:[#allocation11_spill]] %s2567_s4 }
   0x6   :  { %2588 = sst [smem:[#allocation12_spill]] %s2568_s5 }
   0x7   :  { %2589 = sst [smem:[#allocation13_spill]] %s2569_s6 }
   0x8   :  { %2590 = sst [smem:[#allocation14_spill]] %s2570_s7 }
   0x9   :  { %2591 = sst [smem:[#allocation15_spill]] %s2572_s9 }
   0xa LB: > { %2592 = sst [smem:[#allocation2_spill]] %s2171_s20  ;;  %s34_s23 = sadd.s32 1, %s2171_s20  ;;  %s2179_s22 = sphi %s2287_s22, %s25_s22   ;;  %s2175_s21 = sphi %s2285_s21, %s2612_s21   ;;  %s2171_s20 = sphi %s2283_s20, %s2611_s20   ;;  %s2167_s19 = sphi %s2281_s19, %s2610_s19   ;;  %s2163_s18 = sphi %s2279_s18, %s2609_s18  }
   0xb   : > { %2593 = sst [smem:[#allocation3_spill]] %s2175_s21  ;;  %s37_s24 = sadd.s32 1, %s2175_s21 }
   0xc   : > { %2594 = sst [smem:[#allocation4_spill]] %s2179_s22  ;;  %p35_p0 = scmp.ge.s32.totalorder %s34_s23, 2 }
   0xd   : > { %p1853_p1 = scmp.ge.s32.totalorder %s2179_s22, 1  ;;  %p539_p2 = scmp.lt.s32.totalorder %s2179_s22, 5 }
   0xe   : > { %s2614_s23 = smov (%p35_p0, %s34_s23), 0  ;;  %s2616_s24 = smov (!%p35_p0, %s37_s24), %s2175_s21 }
   0xf   : > { %2595 = sst [smem:[#allocation5_spill]] %s2614_s23  ;;  %p540_p3 = pnand %p1853_p1, %p539_p2 }
  0x10   : > { %p39_p4 = scmp.ge.s32.totalorder %s2616_s24, 2  ;;  %p626_p5 = scmp.lt.s32.totalorder (!%p540_p3), %s2167_s19, 1 }
  0x11   : > { %543 = sbr.rel (%p540_p3) target bundleno = 3045 (0xbe5), region = 80  ;;  %p631_p6 = scmp.lt.s32.totalorder (!%p540_p3), %s2163_s18, 1 }
  0x12   : > { %s2618_s24 = smov (%p39_p4, %s2616_s24), 0  ;;  %s2597_s0 = sld [smem:[#allocation7_spill]] (!%p540_p3) }
  0x13   : > { %2596 = sst [smem:[#allocation6_spill]] %s2618_s24  ;;  %p1867_p7 = scmp.ne.s32.totalorder (!%p540_p3), %s2163_s18, 0 }
  0x14   : > { %s2598_s5 = sld [smem:[#allocation12_spill]] (!%p540_p3) }
  0x15   : > { %s2599_s6 = sld [smem:[#allocation13_spill]] (!%p540_p3) }
  0x16   : > { %s2620_s19 = smov (!%p626_p5, %s2167_s19), 1  ;;  %s2600_s7 = sld [smem:[#allocation14_spill]] }
  0x17   : > { %s2313_s25 = scalar_select %p631_p6, %s2163_s18, 1 }
  0x18   : > { %s1914_s26 = sshll.u32 %s2620_s19, 3  ;;  %s2601_s9 = sld [smem:[#allocation15_spill]] }
  0x19   : > { %s630_s29 = scalar_lea.vmem %s2597_s0, %s1914_s26  ;;  %s1856_s30 = sshll.u32 %s2313_s25, 1 }
  0x1a   : > { %s2322_s24 = scalar_lea.vmem %s2598_s5, %s1856_s30  ;;  %s1915_s22 = sshll.u32 %s2313_s25, 4 }
  0x1b   : > { %s2327_s20 = scalar_lea.vmem %s2599_s6, %s1856_s30  ;;  %s2351_s6 = scalar_lea.vmem %s2574_s11, %s1915_s22 }
  0x1c   : > { %s2337_s27 = scalar_lea.vmem %s2600_s7, %s1915_s22  ;;  %s662_s1 = scalar_lea.vmem %s2575_s12, %s2313_s25 }
  0x1d   : > { %s1918_s2 = sshll.u32 %s2313_s25, 5  ;;  %s670_s5 = scalar_lea.vmem %s2577_s14, %s2313_s25 }
  0x1e   : > { %s2342_s16 = scalar_lea.vmem %s2601_s9, %s1915_s22  ;;  %s2361_s0 = scalar_lea.vmem %s2576_s13, %s1918_s2 }
  0x1f   : > { %s2370_s23 = scalar_lea.vmem %s2578_s15, %s1914_s26  ;;  %679 = sbr.rel (%p1867_p7) target bundleno = 590 (0x24e), region = 84 }
  0x20   : > { %s2602_s3 = sld [smem:[#allocation9_spill]] (!%p1867_p7) }
  0x21   : > { %s2603_s30 = sld [smem:[#allocation8_spill]] (!%p1867_p7) }
  0x22   : > { %s2604_s19 = sld [smem:[#allocation10_spill]] (!%p1867_p7) }
  0x23   : > { %s2605_s18 = sld [smem:[#allocation11_spill]] (!%p1867_p7) }
  0x24   : > { %v2181_v1 = vmov 0   ;;  %v680_v5 = vld [vmem:[%s630_s29] sm:$0x77]  ;;  %vm784_vm0 = vcmask 523264   ;;  %vm830_vm1 = vcmask 258048  }
  0x25   : > { %788 = vmatprep.subr.bf16.mxu0 %v2181_v1  ;;  %v1869_v6 = vcombine.high %v680_v5, %v680_v5  ;;  %v1868_v15 = vcombine.low %v680_v5, %v680_v5 }
  0x26   : > { %v2091_v0 = vld [vmem:[%s2602_s3 + $0x38] sm:$0xff]   ;;  %v2092_v2 = vld [vmem:[%s2602_s3 + $0x30] sm:$0xff]   ;;  %v2093_v3 = vld [vmem:[%s2602_s3 + $0x28] sm:$0xff]  }
  0x27   : > { %789 = vmatpush1.bf16.msra.mxu0 %v2091_v0  ;;  %v2094_v4 = vld [vmem:[%s2602_s3 + $0x20] sm:$0xff]   ;;  %v2095_v7 = vld [vmem:[%s2602_s3 + $0x18] sm:$0xff]   ;;  %1882 = vmatprep.mubr.msk.bf16.mxu0 %vm784_vm0, %v1869_v6  ;;  %v2096_v8 = vld [vmem:[%s2602_s3 + $0x10] sm:$0xff]  }
  0x28   : > { %790 = vmatprep.subr.bf16.mxu0 %v2181_v1  ;;  %v2097_v9 = vld [vmem:[%s2602_s3 + $0x8] sm:$0xff]   ;;  %v2098_v10 = vld [vmem:[%s2602_s3] sm:$0xff]   ;;  %v2099_v11 = vld [vmem:[%s2602_s3 + $0x58] sm:$0xff]  }
  0x29   : > { %v2100_v12 = vld [vmem:[%s2602_s3 + $0x50] sm:$0xff]   ;;  %v2101_v13 = vld [vmem:[%s2602_s3 + $0x48] sm:$0xff]   ;;  %v2102_v14 = vld [vmem:[%s2602_s3 + $0x40] sm:$0xff]  }
  0x2a   : > { %v705_v16 = vld [vmem:[%s2603_s30] sm:$0x1f] }
  0x2b   : > { %791 = vmatpush1.bf16.msra.mxu0 %v2092_v2  ;;  %v1883_v32 = vld [vmem:[%s2604_s19] ss:$0 sm:$0xff] }
  0x2c   : > { %792 = vmatprep.subr.bf16.mxu0 %v2181_v1  ;;  %v1884_v34 = vld [vmem:[%s2605_s18] ss:$0 sm:$0xff] }
  0x2f   : > { %793 = vmatpush1.bf16.msra.mxu0 %v2093_v3 }
  0x30   : > { %794 = vmatprep.subr.bf16.mxu0 %v2181_v1 }
  0x33   : > { %795 = vmatpush1.bf16.msra.mxu0 %v2094_v4 }
  0x34   : > { %796 = vmatprep.subr.bf16.mxu0 %v2181_v1 }
  0x37   : > { %797 = vmatpush1.bf16.msra.mxu0 %v2095_v7 }
  0x38   : > { %798 = vmatprep.subr.bf16.mxu0 %v2181_v1 }
  0x3b   : > { %799 = vmatpush1.bf16.msra.mxu0 %v2096_v8 }
  0x3c   : > { %800 = vmatprep.subr.bf16.mxu0 %v2181_v1 }
  0x3f   : > { %801 = vmatpush1.bf16.msra.mxu0 %v2097_v9 }
  0x40   : > { %802 = vmatprep.subr.bf16.mxu0 %v2181_v1 }
  0x43   : > { %803 = vmatpush1.bf16.msra.mxu0 %v2098_v10 }
  0x44   : > { %812 = vmatprep.subr.bf16.mxu0 %v2181_v1 }
  0x47   : > { %813 = vmatpush2.bf16.msra.mxu0 %v2099_v11 }
  0x48   : > { %814 = vmatprep.subr.bf16.mxu0 %v2181_v1 }
  0x4b   : > { %815 = vmatpush2.bf16.msra.mxu0 %v2100_v12 }
  0x4c   : > { %816 = vmatprep.subr.bf16.mxu0 %v2181_v1 }
  0x4f   : > { %817 = vmatpush2.bf16.msra.mxu0 %v2101_v13 }
  0x50   : > { %818 = vmatprep.subr.bf16.mxu0 %v2181_v1 }
  0x53   : > { %819 = vmatpush2.bf16.msra.mxu0 %v2102_v14 }
  0x56   : > { %821 = vmatmul.mubr.bf16.vlgmr.msra.gmra.mxu0 %v1868_v15 }
 0x116   : > { %v822_v17 = vpop.f32.mrf.mxu0 }
 0x117   : > { %v823_v18 = vadd.f32 %v822_v17, %v705_v16 }
 0x118   : > { %v824_v19 = vpop.f32.mrf.mxu0 }
 0x119   : > { %v831_v20 = vsel %vm830_vm1, %v823_v18, 0.0 }
 0x11a   : > { %v825_v21 = vpop.f32.mrf.mxu0  ;;  %832 = vadd.xlane.f32.xlu0 %v831_v20 }
 0x11c   : > { %v826_v22 = vpop.f32.mrf.mxu0 }
 0x1a3   : > { %v833_v23 = vpop.xlane.xlu0 %832 }
 0x1a4   : > { %v835_v24 = vmul.f32 0.03125, %v833_v23 }
 0x1a6   : > { %v836_v25 = vsub.f32 %v823_v18, %v835_v24 }
 0x1a8   : > { %v837_v26 = vmul.f32 %v836_v25, %v836_v25 }
 0x1aa   : > { %v838_v27 = vsel %vm830_vm1, %v837_v26, 0.0 }
 0x1ab   : > { %839 = vadd.xlane.f32.xlu0 %v838_v27 }
 0x234   : > { %v840_v28 = vpop.xlane.xlu0 %839 }
 0x235   : > { %v841_v29 = vmul.f32 0.03125, %v840_v28 }
 0x237   : > { %v842_v30 = vadd.f32 1e-05, %v841_v29 }
 0x239   : > { %2105 = vrsqrt.f32 %v842_v30 }
 0x246   : > { %v2106_v31 = vpop.eup %2105 }
 0x247   : > { %v844_v33 = vmul.f32 %v2106_v31, %v836_v25 }
 0x249   : > { %v851_v35 = vmul.f32 %v1883_v32, %v844_v33 }
 0x24b   : > { %v858_v36 = vadd.f32 %v1884_v34, %v851_v35 }
 0x24d   : > { %859 = vst.msk [vmem:[%s2370_s23] sm:$0x1f] %vm830_vm1, %v858_v36 }
 0x24e PF: > { %vm863_vm2 = vcmask 258048   ;;  %v2107_v44 = vld [vmem:[%s2337_s27 + $0x8] sm:$0xff]   ;;  %v2182_v45 = vmov 0.0   ;;  %vm2183_vm3 = vmmov 0   ;;  %v2108_v46 = vld [vmem:[%s2337_s27] sm:$0xff]   ;;  %v878_v47 = vlaneseq  ;;  %s2606_s27 = scalar_lea.vmem %s2571_s8, %s2313_s25  ;;  %s2184_s26 = smov 96  }
 0x24f   : > { %1949 = vmatprep.subr.bf16.mxu0 %v2182_v45  ;;  %1953 = vmatprep.mubr.msk.bf16.mxu0 %vm2183_vm3, %v2182_v45  ;;  %v861_v50 = vld [vmem:[%s2322_s24] sm:$0x3]  ;;  %vm912_vm4 = vcmask 261120   ;;  %s2185_s4 = smov 120   ;;  %s2186_s2 = smov 88   ;;  %vm962_vm5 = vcmask 64512  }
 0x250   : > { %1950 = vmatpush3.bf16.msra.mxu0 %v2107_v44  ;;  %1957 = vmatprep.subr.bf16.mxu1 %v2182_v45  ;;  %v879_v48 = vshrl.u32 %v878_v47, 7  ;;  %v862_v51 = vld [vmem:[%s2327_s20] sm:$0x3]  ;;  %s2187_s28 = smov 80   ;;  %s2188_s17 = smov 112   ;;  %vm1009_vm6 = vcmask 36864  }
 0x251   : > { %1951 = vmatprep.subr.bf16.mxu0 %v2182_v45  ;;  %1959 = vmatprep.mubr.msk.bf16.mxu1 %vm2183_vm3, %v2182_v45  ;;  %v1885_v1 = vld [vmem:[%s2606_s27] ss:$0 sm:$0xff]  ;;  %s2189_s22 = smov 72   ;;  %s2190_s30 = smov 104   ;;  %vm1028_vm7 = vcmask 1041408   ;;  %vm1029_vm8 = vcmask 1042432  }
 0x252   : > { %v1507_v49 = vsub.s32 1, %v879_v48  ;;  %v880_v57 = vsub.s32 0, %v879_v48  ;;  %s2191_s29 = smov 64   ;;  %s2192_s7 = smov 56   ;;  %vm1024_vm9 = vcmask 39936   ;;  %vm1419_vm10 = vcmask 130048  }
 0x253   : > { %s2193_s19 = smov 48   ;;  %s2194_s9 = smov 40   ;;  %vm1421_vm11 = vcmask 195584   ;;  %vm1623_vm12 = vcmask 523264  }
 0x254   : > { %v2423_v37 = vld [vmem:[%s2370_s23] sm:$0x1f]  ;;  %1952 = vmatpush3.bf16.msra.mxu0 %v2108_v46  ;;  %v2441_v52 = vrot.slane %v861_v50, %v1507_v49  ;;  %v2443_v53 = vrot.slane %v862_v51, %v1507_v49  ;;  %v881_v58 = vrot.slane %v861_v50, %v880_v57  ;;  %v886_v61 = vrot.slane %v862_v51, %v880_v57  ;;  %s2196_s21 = smov 8   ;;  %s2197_s18 = smov 16  }
 0x255   : > { %v864_v38 = vsel %vm863_vm2, %v2423_v37, 0.0  ;;  %1963 = vmatprep.subr.bf16.mxu0 %v2182_v45  ;;  %s2198_s20 = smov 24   ;;  %s2607_s27 = scalar_lea.vmem %s2573_s10, %s2313_s25 }
 0x256   : > { %865 = vadd.xlane.f32.xlu0 %v864_v38 }
 0x2df   : > { %v866_v39 = vpop.xlane.xlu0 %865 }
 0x2e0   : > { %v868_v40 = vmul.f32 0.03125, %v866_v39 }
 0x2e2   : > { %v869_v41 = vsub.f32 %v2423_v37, %v868_v40 }
 0x2e4   : > { %v870_v42 = vmul.f32 %v869_v41, %v869_v41 }
 0x2e6   : > { %v871_v43 = vsel %vm863_vm2, %v870_v42, 0.0 }
 0x2e7   : > { %872 = vadd.xlane.f32.xlu0 %v871_v43 }
 0x370   : > { %v873_v54 = vpop.xlane.xlu0 %872 }
 0x371   : > { %v874_v55 = vmul.f32 0.03125, %v873_v54 }
 0x373   : > { %v875_v56 = vadd.f32 1e-05, %v874_v55 }
 0x375   : > { %2117 = vrsqrt.f32 %v875_v56 }
 0x382   : > { %v2118_v59 = vpop.eup %2117 }
 0x383   : > { %v877_v60 = vmul.f32 %v2118_v59, %v869_v41 }
 0x385   : > { %v882_v62 = vmul.f32 %v881_v58, %v877_v60 }
 0x387   : > { %v887_v63 = vadd.f32 %v886_v61, %v882_v62 }
 0x389   : > { %v888_v0 = vpack.c.bf16 %v887_v63, %v887_v63 }
 0x38b   : > { %1954 = vmatmul.mubr.msk.bf16.vlgmr.msra.gmra.mxu0 %vm912_vm4, %v888_v0 }
 0x38c   : > { %1965 = vmatprep.mubr.msk.bf16.mxu0 %vm2183_vm3, %v2182_v45 }
 0x44b   : > { %v950_v2 = vpop.f32.mrf.mxu0 }
 0x44c   : > { %v951_v3 = vadd.f32 %v1885_v1, %v950_v2  ;;  %v2195_v1 = vmov 65535  }
 0x44d   : > { %v1955_v4 = vpop.f32.mrf.mxu0  ;;  %v1030_v2 = vsel %vm1028_vm7, 4294967295, %v2195_v1 }
 0x44e   : > { %v956_v5 = vmul.f32 0.35355338, %v951_v3  ;;  %v2453_v6 = vpack.c.bf16 %v951_v3, %v951_v3  ;;  %v1031_v4 = vsel %vm1029_vm8, %v1030_v2, 0 }
 0x44f   : > { %v953_v7 = vpop.f32.mrf.mxu0 }
 0x450   : > { %v957_v8 = vpack.c.bf16 %v956_v5, %v956_v5  ;;  %960 = vrot.lane.b32.xlu1 %v2453_v6, %s2184_s26 }
 0x451   : > { %v1956_v9 = vpop.f32.mrf.mxu0 }
 0x452   : > { %1076 = vrot.lane.b32.xlu0 %v957_v8, %s2185_s4 }
 0x454   : > { %1078 = vrot.lane.b32.xlu1 %v2453_v6, %s2186_s2 }
 0x458   : > { %1188 = vrot.lane.b32.xlu1 %v2453_v6, %s2187_s28 }
 0x45c   : > { %1186 = vrot.lane.b32.xlu1 %v957_v8, %s2188_s17 }
 0x460   : > { %1298 = vrot.lane.b32.xlu1 %v2453_v6, %s2189_s22 }
 0x464   : > { %1296 = vrot.lane.b32.xlu1 %v957_v8, %s2190_s30 }
 0x4c2   : > { %v961_v10 = vpop.permute.xlu1 %960 }
 0x4c3   : > { %v967_v11 = vsel %vm962_vm5, %v961_v10, 0 }
 0x4c4   : > { %1958 = vmatpush3.bf16.xpose.msra.mxu1 %v967_v11  ;;  %v1077_v15 = vpop.permute.xlu0 %1076 }
 0x4c5   : > { %1969 = vmatprep.subr.bf16.mxu1 %v2182_v45 }
 0x4c6   : > { %v1079_v12 = vpop.permute.xlu1 %1078 }
 0x4c7   : > { %v1084_v13 = vsel %vm962_vm5, %v1079_v12, 0 }
 0x4ca   : > { %v1189_v14 = vpop.permute.xlu1 %1188 }
 0x4cb   : > { %1960 = vmatmul.mubr.msk.bf16.vlgmr.msra.gmra.mxu1 %vm962_vm5, %v957_v8  ;;  %v1194_v17 = vsel %vm962_vm5, %v1189_v14, 0 }
 0x4cc   : > { %1970 = vmatpush3.bf16.xpose.msra.mxu1 %v1084_v13  ;;  %1971 = vmatprep.mubr.msk.bf16.mxu1 %vm2183_vm3, %v2182_v45 }
 0x4cd   : > { %1981 = vmatprep.subr.bf16.mxu1 %v2182_v45 }
 0x4ce   : > { %v1187_v16 = vpop.permute.xlu1 %1186 }
 0x4d2   : > { %v1299_v18 = vpop.permute.xlu1 %1298 }
 0x4d3   : > { %1972 = vmatmul.mubr.msk.bf16.vlgmr.msra.gmra.mxu1 %vm962_vm5, %v1077_v15  ;;  %v1304_v19 = vsel %vm962_vm5, %v1299_v18, 0 }
 0x4d4   : > { %1982 = vmatpush3.bf16.xpose.msra.mxu1 %v1194_v17  ;;  %1983 = vmatprep.mubr.msk.bf16.mxu1 %vm2183_vm3, %v2182_v45 }
 0x4d5   : > { %1993 = vmatprep.subr.bf16.mxu1 %v2182_v45 }
 0x4d6   : > { %v1297_v20 = vpop.permute.xlu1 %1296 }
 0x4db   : > { %1984 = vmatmul.mubr.msk.bf16.vlgmr.msra.gmra.mxu1 %vm962_vm5, %v1187_v16 }
 0x4dc   : > { %1994 = vmatpush3.bf16.xpose.msra.mxu1 %v1304_v19  ;;  %1995 = vmatprep.mubr.msk.bf16.mxu1 %vm2183_vm3, %v2182_v45 }
 0x4dd   : > { %2005 = vmatprep.subr.bf16.mxu1 %v2182_v45 }
 0x4e3   : > { %1996 = vmatmul.mubr.msk.bf16.vlgmr.msra.gmra.mxu1 %vm962_vm5, %v1297_v20 }
 0x4e4   : > { %2009 = vmatprep.mubr.msk.bf16.mxu1 %vm2183_vm3, %v2182_v45 }
 0x58b   : > { %v1003_v21 = vpop.f32.mrf.mxu1 }
 0x58c   : > { %v1010_v22 = vsel %vm1009_vm6, %v1003_v21, -inf }
 0x58d   : > { %1011 = vmax.xlane.f32.xlu1 %v1010_v22  ;;  %v1961_v23 = vpop.f32.mrf.mxu1 }
 0x58f   : > { %v1006_v24 = vpop.f32.mrf.mxu1 }
 0x591   : > { %v1962_v25 = vpop.f32.mrf.mxu1 }
 0x593   : > { %v1120_v26 = vpop.f32.mrf.mxu1 }
 0x594   : > { %v1126_v27 = vsel %vm1009_vm6, %v1120_v26, -inf }
 0x595   : > { %1127 = vmax.xlane.f32.xlu0 %v1126_v27  ;;  %v1973_v28 = vpop.f32.mrf.mxu1 }
 0x597   : > { %v1123_v29 = vpop.f32.mrf.mxu1 }
 0x599   : > { %v1974_v30 = vpop.f32.mrf.mxu1 }
 0x59b   : > { %v1230_v31 = vpop.f32.mrf.mxu1 }
 0x59c   : > { %v1236_v32 = vsel %vm1009_vm6, %v1230_v31, -inf }
 0x59d   : > { %1237 = vmax.xlane.f32.xlu1 %v1236_v32  ;;  %v1985_v33 = vpop.f32.mrf.mxu1 }
 0x59f   : > { %v1233_v34 = vpop.f32.mrf.mxu1 }
 0x5a1   : > { %v1986_v35 = vpop.f32.mrf.mxu1 }
 0x5a3   : > { %v1340_v36 = vpop.f32.mrf.mxu1 }
 0x5a4   : > { %v1346_v38 = vsel %vm1009_vm6, %v1340_v36, -inf }
 0x5a5   : > { %1347 = vmax.xlane.f32.xlu0 %v1346_v38  ;;  %v1997_v39 = vpop.f32.mrf.mxu1  ;;  %v2110_v38 = vld [vmem:[%s2342_s16] sm:$0xff]  }
 0x5a7   : > { %v1343_v40 = vpop.f32.mrf.mxu1 }
 0x5a9   : > { %v1998_v41 = vpop.f32.mrf.mxu1 }
 0x616   : > { %v1012_v42 = vpop.xlane.xlu1 %1011 }
 0x617   : > { %v1013_v43 = vsub.f32 %v1003_v21, %v1012_v42 }
 0x619   : > { %v1014_v44 = vmul.f32 1.442695, %v1013_v43 }
 0x61b   : > { %2119 = vpow2.f32 %v1014_v44 }
 0x61e   : > { %v1128_v46 = vpop.xlane.xlu0 %1127 }
 0x61f   : > { %v1129_v47 = vsub.f32 %v1120_v26, %v1128_v46 }
 0x621   : > { %v1130_v48 = vmul.f32 1.442695, %v1129_v47 }
 0x623   : > { %2121 = vpow2.f32 %v1130_v48 }
 0x626   : > { %v1238_v60 = vpop.xlane.xlu1 %1237 }
 0x627   : > { %v1239_v61 = vsub.f32 %v1230_v31, %v1238_v60 }
 0x628   : > { %v2120_v49 = vpop.eup %2119 }
 0x629   : > { %v1016_v50 = vsel %vm1009_vm6, %v2120_v49, 0.0  ;;  %v1240_v62 = vmul.f32 1.442695, %v1239_v61 }
 0x62a   : > { %1017 = vadd.xlane.f32.xlu1 %v1016_v50 }
 0x62e   : > { %v1348_v51 = vpop.xlane.xlu0 %1347 }
 0x62f   : > { %v1349_v54 = vsub.f32 %v1340_v36, %v1348_v51  ;;  %v2109_v36 = vld [vmem:[%s2342_s16 + $0x8] sm:$0xff]  }
 0x630   : > { %v2122_v55 = vpop.eup %2121  ;;  %2006 = vmatpush3.bf16.msra.mxu1 %v2109_v36 }
 0x631   : > { %v1350_v56 = vmul.f32 1.442695, %v1349_v54  ;;  %v1132_v57 = vsel %vm1009_vm6, %v2122_v55, 0.0  ;;  %2007 = vmatprep.subr.bf16.mxu1 %v2182_v45 }
 0x632   : > { %1133 = vadd.xlane.f32.xlu0 %v1132_v57 }
 0x633   : > { %2123 = vpow2.f32 %v1350_v56 }
 0x634   : > { %2125 = vpow2.f32 %v1240_v62  ;;  %2008 = vmatpush3.bf16.msra.mxu1 %v2110_v38 }
 0x635   : > { %2021 = vmatprep.subr.bf16.mxu1 %v2182_v45 }
 0x63b   : > { %1022 = vrot.lane.b32.xlu1 %v2453_v6, %s2191_s29 }
 0x640   : > { %v2124_v58 = vpop.eup %2123 }
 0x641   : > { %v1352_v59 = vsel %vm1009_vm6, %v2124_v58, 0.0  ;;  %v2126_v63 = vpop.eup %2125 }
 0x642   : > { %1353 = vadd.xlane.f32.xlu0 %v1352_v59  ;;  %v1242_v0 = vsel %vm1009_vm6, %v2126_v63, 0.0 }
 0x658   : > { %1138 = vrot.lane.b32.xlu0 %v2453_v6, %s2192_s7 }
 0x65f   : > { %1243 = vadd.xlane.f32.xlu1 %v1242_v0 }
 0x670   : > { %1248 = vrot.lane.b32.xlu1 %v2453_v6, %s2193_s19 }
 0x674   : > { %1358 = vrot.lane.b32.xlu1 %v2453_v6, %s2194_s9 }
 0x6b3   : > { %v1018_v3 = vpop.xlane.xlu1 %1017 }
 0x6b4   : > { %2127 = vrcp.f32 %v1018_v3 }
 0x6b7   : > { %v1023_v5 = vpop.permute.xlu1 %1022 }
 0x6b8   : > { %v1033_v7 = vand.u32 %v1031_v4, %v1023_v5 }
 0x6ba   : > { %1964 = vmatpush3.bf16.msra.mxu0 %v1033_v7  ;;  %v2111_v7 = vld [vmem:[%s2351_s6 + $0x8] sm:$0xff]  }
 0x6bb   : > { %1975 = vmatprep.subr.bf16.mxu0 %v2182_v45  ;;  %v1134_v8 = vpop.xlane.xlu0 %1133 }
 0x6bc   : > { %2129 = vrcp.f32 %v1134_v8  ;;  %v2112_v8 = vld [vmem:[%s2351_s6] sm:$0xff]  }
 0x6c1   : > { %v2128_v9 = vpop.eup %2127 }
 0x6c2   : > { %v1020_v10 = vmul.f32 %v2128_v9, %v2120_v49 }
 0x6c4   : > { %v1021_v11 = vpack.c.bf16 %v1020_v10, %v1020_v10 }
 0x6c6   : > { %1966 = vmatmul.mubr.msk.bf16.vlgmr.msra.gmra.mxu0 %vm1024_vm9, %v1021_v11 }
 0x6c7   : > { %1977 = vmatprep.mubr.msk.bf16.mxu0 %vm2183_vm3, %v2182_v45 }
 0x6c9   : > { %v2130_v12 = vpop.eup %2129 }
 0x6ca   : > { %v1136_v14 = vmul.f32 %v2130_v12, %v2122_v55 }
 0x6cb   : > { %v1354_v6 = vpop.xlane.xlu0 %1353 }
 0x6cc   : > { %v1137_v16 = vpack.c.bf16 %v1136_v14, %v1136_v14 }
 0x6cf   : > { %v1139_v13 = vpop.permute.xlu0 %1138 }
 0x6d0   : > { %v1144_v15 = vand.u32 %v1139_v13, %v1031_v4 }
 0x6d2   : > { %1976 = vmatpush3.bf16.msra.mxu0 %v1144_v15  ;;  %v2113_v15 = vld [vmem:[%s2361_s0 + $0x18] sm:$0xff]  }
 0x6d3   : > { %1987 = vmatprep.subr.bf16.mxu0 %v2182_v45 }
 0x6d5   : > { %1978 = vmatmul.mubr.msk.bf16.vlgmr.msra.gmra.mxu0 %vm1024_vm9, %v1137_v16  ;;  %v2114_v16 = vld [vmem:[%s2361_s0 + $0x10] sm:$0xff]  }
 0x6d6   : > { %1989 = vmatprep.mubr.msk.bf16.mxu0 %vm2183_vm3, %v2182_v45 }
 0x6e8   : > { %v1244_v17 = vpop.xlane.xlu1 %1243 }
 0x6e9   : > { %2131 = vrcp.f32 %v1244_v17  ;;  %v2115_v17 = vld [vmem:[%s2361_s0 + $0x8] sm:$0xff]  }
 0x6ea   : > { %2133 = vrcp.f32 %v1354_v6 }
 0x6ec   : > { %v1249_v18 = vpop.permute.xlu1 %1248 }
 0x6ed   : > { %v1254_v19 = vand.u32 %v1249_v18, %v1031_v4  ;;  %v2116_v18 = vld [vmem:[%s2361_s0] sm:$0xff]  }
 0x6ef   : > { %1988 = vmatpush3.bf16.msra.mxu0 %v1254_v19 }
 0x6f0   : > { %1999 = vmatprep.subr.bf16.mxu0 %v2182_v45  ;;  %v1359_v21 = vpop.permute.xlu1 %1358 }
 0x6f1   : > { %v1364_v25 = vand.u32 %v1359_v21, %v1031_v4 }
 0x6f6   : > { %v2132_v20 = vpop.eup %2131 }
 0x6f7   : > { %v1246_v22 = vmul.f32 %v2132_v20, %v2126_v63  ;;  %v2134_v24 = vpop.eup %2133 }
 0x6f8   : > { %v1356_v26 = vmul.f32 %v2134_v24, %v2124_v58  ;;  %v1900_v58 = vld [vmem:[%s2607_s27] ss:$0 sm:$0xff] }
 0x6f9   : > { %v1247_v23 = vpack.c.bf16 %v1246_v22, %v1246_v22 }
 0x6fa   : > { %v1357_v27 = vpack.c.bf16 %v1356_v26, %v1356_v26 }
 0x6fb   : > { %1990 = vmatmul.mubr.msk.bf16.vlgmr.msra.gmra.mxu0 %vm1024_vm9, %v1247_v23 }
 0x6fc   : > { %2000 = vmatpush3.bf16.msra.mxu0 %v1364_v25  ;;  %2001 = vmatprep.mubr.msk.bf16.mxu0 %vm2183_vm3, %v2182_v45 }
 0x6fd   : > { %2013 = vmatprep.subr.bf16.mxu0 %v2182_v45 }
 0x703   : > { %2002 = vmatmul.mubr.msk.bf16.vlgmr.msra.gmra.mxu0 %vm1024_vm9, %v1357_v27 }
 0x704   : > { %2017 = vmatprep.mubr.msk.bf16.mxu0 %vm2183_vm3, %v2182_v45  ;;  %2014 = vmatpush3.bf16.msra.mxu0 %v2111_v7 }
 0x705   : > { %2015 = vmatprep.subr.bf16.mxu0 %v2182_v45 }
 0x708   : > { %2016 = vmatpush3.bf16.msra.mxu0 %v2112_v8 }
 0x786   : > { %v1069_v28 = vpop.f32.mrf.mxu0 }
 0x788   : > { %v1967_v29 = vpop.f32.mrf.mxu0 }
 0x78a   : > { %v1072_v30 = vpop.f32.mrf.mxu0 }
 0x78b   : > { %v1911_v30 = vld [vmem:[%s670_s5] ss:$0 sm:$0xff] }
 0x78c   : > { %v1968_v31 = vpop.f32.mrf.mxu0 }
 0x795   : > { %v1180_v32 = vpop.f32.mrf.mxu0 }
 0x796   : > { %1407 = vrot.lane.b32.xlu0 %v1180_v32, %s2196_s21 }
 0x797   : > { %v1979_v33 = vpop.f32.mrf.mxu0 }
 0x799   : > { %v1183_v34 = vpop.f32.mrf.mxu0 }
 0x79b   : > { %v1980_v35 = vpop.f32.mrf.mxu0 }
 0x7bb   : > { %v1290_v39 = vpop.f32.mrf.mxu0 }
 0x7bc   : > { %1411 = vrot.lane.b32.xlu1 %v1290_v39, %s2197_s18 }
 0x7bd   : > { %v1991_v40 = vpop.f32.mrf.mxu0 }
 0x7bf   : > { %v1293_v41 = vpop.f32.mrf.mxu0 }
 0x7c1   : > { %v1992_v42 = vpop.f32.mrf.mxu0 }
 0x7c3   : > { %v1400_v43 = vpop.f32.mrf.mxu0 }
 0x7c4   : > { %1415 = vrot.lane.b32.xlu0 %v1400_v43, %s2198_s20 }
 0x7c5   : > { %v2003_v44 = vpop.f32.mrf.mxu0 }
 0x7c7   : > { %v1403_v46 = vpop.f32.mrf.mxu0 }
 0x7c9   : > { %v2004_v47 = vpop.f32.mrf.mxu0 }
 0x808   : > { %v1408_v48 = vpop.permute.xlu0 %1407 }
 0x809   : > { %v1418_v50 = vsel %vm962_vm5, %v1069_v28, %v1408_v48 }
 0x82e   : > { %v1412_v49 = vpop.permute.xlu1 %1411 }
 0x82f   : > { %v1420_v51 = vsel %vm1419_vm10, %v1418_v50, %v1412_v49 }
 0x836   : > { %v1416_v54 = vpop.permute.xlu0 %1415 }
 0x837   : > { %v1422_v55 = vsel %vm1421_vm11, %v1420_v51, %v1416_v54 }
 0x838   : > { %v1423_v56 = vpack.c.bf16 %v1422_v55, %v1422_v55 }
 0x83a   : > { %2010 = vmatmul.mubr.msk.bf16.vlgmr.msra.gmra.mxu1 %vm912_vm4, %v1423_v56 }
 0x83b   : > { %2029 = vmatprep.mubr.msk.bf16.mxu1 %vm2183_vm3, %v2182_v45  ;;  %2022 = vmatpush3.bf16.msra.mxu1 %v2113_v15 }
 0x83c   : > { %2023 = vmatprep.subr.bf16.mxu1 %v2182_v45 }
 0x83f   : > { %2024 = vmatpush3.bf16.msra.mxu1 %v2114_v16 }
 0x840   : > { %2025 = vmatprep.subr.bf16.mxu1 %v2182_v45 }
 0x843   : > { %2026 = vmatpush3.bf16.msra.mxu1 %v2115_v17 }
 0x844   : > { %2027 = vmatprep.subr.bf16.mxu1 %v2182_v45 }
 0x847   : > { %2028 = vmatpush3.bf16.msra.mxu1 %v2116_v18 }
 0x8fa   : > { %v1477_v57 = vpop.f32.mrf.mxu1 }
 0x8fb   : > { %v1483_v59 = vadd.f32 %v1477_v57, %v2423_v37 }
 0x8fc   : > { %v2011_v60 = vpop.f32.mrf.mxu1 }
 0x8fd   : > { %v1491_v61 = vadd.f32 %v1900_v58, %v1483_v59 }
 0x8fe   : > { %v1480_v62 = vpop.f32.mrf.mxu1 }
 0x8ff   : > { %v1492_v63 = vsel %vm863_vm2, %v1491_v61, 0.0 }
 0x900   : > { %1493 = vadd.xlane.f32.xlu1 %v1492_v63  ;;  %v2012_v0 = vpop.f32.mrf.mxu1 }
 0x989   : > { %v1494_v1 = vpop.xlane.xlu1 %1493 }
 0x98a   : > { %v1495_v2 = vmul.f32 0.03125, %v1494_v1 }
 0x98c   : > { %v1496_v3 = vsub.f32 %v1491_v61, %v1495_v2 }
 0x98e   : > { %v1497_v4 = vmul.f32 %v1496_v3, %v1496_v3 }
 0x990   : > { %v1498_v5 = vsel %vm863_vm2, %v1497_v4, 0.0 }
 0x991   : > { %1499 = vadd.xlane.f32.xlu0 %v1498_v5 }
 0xa1a   : > { %v1500_v37 = vpop.xlane.xlu0 %1499 }
 0xa1b   : > { %v1501_v9 = vmul.f32 0.03125, %v1500_v37 }
 0xa1d   : > { %v1502_v10 = vadd.f32 1e-05, %v1501_v9 }
 0xa1f   : > { %2135 = vrsqrt.f32 %v1502_v10 }
 0xa2c   : > { %v2136_v11 = vpop.eup %2135 }
 0xa2d   : > { %v1504_v6 = vmul.f32 %v2136_v11, %v1496_v3 }
 0xa2f   : > { %v1509_v12 = vmul.f32 %v2441_v52, %v1504_v6  ;;  %v1901_v52 = vld [vmem:[%s662_s1] ss:$0 sm:$0xff] }
 0xa31   : > { %v1514_v13 = vadd.f32 %v2443_v53, %v1509_v12 }
 0xa33   : > { %v1515_v14 = vpack.c.bf16 %v1514_v13, %v1514_v13 }
 0xa35   : > { %2018 = vmatmul.mubr.msk.bf16.vlgmr.msra.gmra.mxu0 %vm912_vm4, %v1515_v14 }
 0xaf5   : > { %v1576_v53 = vpop.f32.mrf.mxu0 }
 0xaf6   : > { %v1577_v19 = vadd.f32 %v1901_v52, %v1576_v53 }
 0xaf7   : > { %v2019_v20 = vpop.f32.mrf.mxu0 }
 0xaf8   : > { %v1905_v21 = vmul.f32 -1.702, %v1577_v19 }
 0xaf9   : > { %v1579_v22 = vpop.f32.mrf.mxu0 }
 0xafa   : > { %v1584_v23 = vmul.f32 1.442695, %v1905_v21 }
 0xafb   : > { %v2020_v24 = vpop.f32.mrf.mxu0 }
 0xafc   : > { %2137 = vpow2.f32 %v1584_v23 }
 0xb09   : > { %v2138_v25 = vpop.eup %2137 }
 0xb0a   : > { %v1586_v26 = vadd.f32 1.0, %v2138_v25 }
 0xb0c   : > { %2139 = vrcp.f32 %v1586_v26 }
 0xb19   : > { %v2140_v45 = vpop.eup %2139 }
 0xb1a   : > { %v1589_v27 = vmul.f32 %v2140_v45, %v1577_v19 }
 0xb1c   : > { %v1590_v28 = vpack.c.bf16 %v1589_v27, %v1589_v27 }
 0xb1e   : > { %2030 = vmatmul.mubr.msk.bf16.vlgmr.msra.gmra.mxu1 %vm1623_vm12, %v1590_v28 }
 0xbde   : > { %v1661_v29 = vpop.f32.mrf.mxu1 }
 0xbdf   : > { %v1667_v31 = vadd.f32 %v1661_v29, %v1491_v61 }
 0xbe0   : > { %v2031_v32 = vpop.f32.mrf.mxu1 }
 0xbe1   : > { %v1675_v33 = vadd.f32 %v1911_v30, %v1667_v31 }
 0xbe2   : > { %v1664_v34 = vpop.f32.mrf.mxu1 }
 0xbe3   : > { %1676 = vst.msk [vmem:[%s2370_s23] sm:$0x1f] %vm863_vm2, %v1675_v33 }
 0xbe4   : > { %v2032_v35 = vpop.f32.mrf.mxu1 }
 0xbe5 PF: > { %s2608_s4 = sld [smem:[#allocation4_spill]] }
 0xbe6   : > { %s2609_s18 = sld [smem:[#allocation2_spill]] }
 0xbe7   : > { %s2610_s19 = sld [smem:[#allocation3_spill]] }
 0xbe8   : > { %s2611_s20 = sld [smem:[#allocation5_spill]] }
 0xbe9   : > { %s2612_s21 = sld [smem:[#allocation6_spill]] }
 0xbeb   : > { %s25_s22 = sadd.s32 1, %s2608_s4  }
 0xbec   : > { %p22_p8 = scmp.ge.s32.totalorder %s25_s22, 6  }
 0xbee   :  { %24 = sbr.rel (!%p22_p8) target bundleno = 10 (0xa), region = 144 }

</bundles_post_ra>
